<compile_context>
chip_gen: v6e
topology: v6e:2x2x1
jax: 0.10.0
libtpu: 0.0.40
codegen_flags: <defaults>
</compile_context>

<pallas_src>
import jax
import jax.numpy as jnp
from jax import lax
from jax.experimental import pallas as pl
from jax.experimental.pallas import tpu as pltpu

_BIG = 1e30  # sentinel "infinite" distance for masked-out points


def _loss_kernel(pred_dn_ref, tgt_dn_ref,    # (TB, 3, N)  pred / target, coord-major
                 predpm_ref,                 # (TB, 4, N)  rows 0-2: points+pred (x penalized), row 3: mask
                 cleanm_ref,                 # (TB, N, 4)  cols 0-2: points+target (x penalized), col 3: mask
                 out_ref):                   # (1, 1, 128)
    """Processes TB batches per grid step; writes per-step partial sums
    [sum(l1*mask), sum(mask), sum(per-batch chamfer)] into lanes 0..2."""
    tb_count = pred_dn_ref.shape[0]

    def body(tb, carry):
        l1_acc, m_acc, cd_acc = carry

        pred_dn = pred_dn_ref[tb]        # (3, N)
        tgt_dn = tgt_dn_ref[tb]          # (3, N)
        pm = predpm_ref[tb]              # (4, N)
        cm = cleanm_ref[tb]              # (N, 4)

        mrow = pm[3:4, :]                # (1, N) mask, row-oriented
        mcol = cm[:, 3:4]                # (N, 1) mask, column-oriented (free: packed in cm)

        # ---- masked L1 term (lane-dense): mean_k |pred - target| per point --
        diff = jnp.abs(pred_dn - tgt_dn)                                     # (3, N)
        per_pt = (diff[0:1, :] + diff[1:2, :] + diff[2:3, :]) * (1.0 / 3.0)  # (1, N)
        l1_acc = l1_acc + jnp.sum(per_pt * mrow)
        m_sum = jnp.sum(mrow)
        m_acc = m_acc + m_sum

        # ---- L1 chamfer distance on masked points --------------------------
        # dist[i, j] = || clean_i - pred_points_j ||_1 ; masked rows/columns
        # are already ~BIG because (1-mask)*BIG was folded into the x coords.
        dist = jnp.abs(cm[:, 0:1] - pm[0:1, :])
        dist = dist + jnp.abs(cm[:, 1:2] - pm[1:2, :])
        dist = dist + jnp.abs(cm[:, 2:3] - pm[2:3, :])

        d_xy = jnp.min(dist, axis=1, keepdims=True)   # (N, 1) min over pred points
        d_yx = jnp.min(dist, axis=0, keepdims=True)   # (1, N) min over clean points

        # (mean over valid of d_xy) + (mean over valid of d_yx)
        # NB: if a batch had zero valid points this divides by zero, matching
        # the degenerate behaviour of the PyTorch reference.
        cd_acc = cd_acc + (jnp.sum(d_xy * mcol) + jnp.sum(d_yx * mrow)) / m_sum
        return l1_acc, m_acc, cd_acc

    zero = jnp.float32(0.0)
    # fori_loop (not a Python unroll) bounds live ranges: one dist matrix live.
    l1_acc, m_acc, cd_acc = lax.fori_loop(0, tb_count, body, (zero, zero, zero))

    lane = lax.broadcasted_iota(jnp.int32, out_ref.shape, 2)
    out_ref[...] = (jnp.where(lane == 0, l1_acc, 0.0)
                    + jnp.where(lane == 1, m_acc, 0.0)
                    + jnp.where(lane == 2, cd_acc, 0.0)).astype(jnp.float32)


def _num_tensorcores_per_chip():
    """v7x packs 2 TensorCores per chip; v5e/v6e have 1. Perf heuristic only."""
    try:
        kind = jax.devices()[0].device_kind.lower()
    except Exception:
        return 1
    return 2 if "v7" in kind else 1


def _pick_batch_tile(batch, num_tensorcores, max_tb=16):
    """Choose the per-grid-step batch tile TB (a divisor of `batch`).

    * 2-TC parts (v7x): prefer the largest TB whose step count G = batch/TB is
      EVEN, so the 'parallel' batch axis splits evenly across both cores.
    * 1-TC parts (v5e/v6e): just take the largest TB <= max_tb — fewer, fatter
      steps amortize the ~0.35 us per-step overhead (grid parallelism is a
      no-op on a single core)."""
    divisors = [d for d in range(1, min(batch, max_tb) + 1) if batch % d == 0]
    if num_tensorcores >= 2:
        even = [d for d in divisors if (batch // d) % 2 == 0]
        if even:
            return max(even)
        multi = [d for d in divisors if batch // d >= 2]
        if multi:
            return max(multi)
    return max(divisors)


def masked_adaptive_l1_chamfer_loss(pred, target, mask, points,
                                    converging_to="chamfer", batch_tile=None):
    """pred/target/points: (B, N, 3) f32, mask: (B, N) f32 in {0,1}. Scalar out."""
    pred = pred.astype(jnp.float32)
    target = target.astype(jnp.float32)
    points = points.astype(jnp.float32)
    mask = mask.astype(jnp.float32)

    B, N, D = pred.shape
    assert D == 3

    TB = _pick_batch_tile(B, _num_tensorcores_per_chip()) if batch_tile is None \
        else batch_tile
    assert B % TB == 0
    G = B // TB

    # --- wrapper-side layout prep (all O(B*N), trivial vs the O(N^2) kernel) --
    pen = (1.0 - mask) * _BIG            # (B, N): BIG for masked points
    m3 = mask[:, :, None]                # (B, N, 1)

    pred_dn = jnp.transpose(pred, (0, 2, 1))      # (B, 3, N)
    tgt_dn = jnp.transpose(target, (0, 2, 1))     # (B, 3, N)

    predp = (points + pred).at[:, :, 0].add(pen)  # penalize x of masked pred points
    predpm_dn = jnp.transpose(jnp.concatenate([predp, m3], axis=2), (0, 2, 1))  # (B, 4, N)

    clean = (points + target).at[:, :, 0].add(pen)  # penalize x of masked clean points
    cleanm_nd = jnp.concatenate([clean, m3], axis=2)                             # (B, N, 4)

    dn3_spec = pl.BlockSpec((TB, 3, N), lambda i: (i, 0, 0))
    dn4_spec = pl.BlockSpec((TB, 4, N), lambda i: (i, 0, 0))
    nd4_spec = pl.BlockSpec((TB, N, 4), lambda i: (i, 0, 0))
    out_spec = pl.BlockSpec((1, 1, 128), lambda i: (i, 0, 0))

    partial = pl.pallas_call(
        _loss_kernel,
        out_shape=jax.ShapeDtypeStruct((G, 1, 128), jnp.float32),
        grid_spec=pltpu.PrefetchScalarGridSpec(
            num_scalar_prefetch=0,
            grid=(G,),
            in_specs=[dn3_spec, dn3_spec, dn4_spec, nd4_spec],
            out_specs=out_spec,
        ),
        compiler_params=pltpu.CompilerParams(
            dimension_semantics=("parallel",)),
    )(pred_dn, tgt_dn, predpm_dn, cleanm_nd)

    # Tiny scalar epilogue (glue) — reproduces the PyTorch combination exactly.
    l1 = jnp.sum(partial[:, 0, 0]) / jnp.sum(partial[:, 0, 1])
    cd = jnp.sum(partial[:, 0, 2]) / B
    if converging_to == "chamfer":
        return l1 + jnp.exp(-l1) * cd
    elif converging_to == "L1":
        return cd + jnp.exp(-cd) * l1
    else:
        raise ValueError(f"Limit of loss {converging_to} not implemented")


def _ref_loss(pred, target, mask, points, converging_to="chamfer"):
    """Pure-JAX (eager) reference mirroring the PyTorch module."""
    loss = jnp.abs(pred - target).mean(axis=2) * mask
    l1 = loss.sum() / mask.sum()
    clean = points + target
    predp = points + pred
    B = mask.shape[0]
    cd = jnp.float32(0.0)
    for b in range(B):
        sel = mask[b] > 0
        X = clean[b][sel]
        Y = predp[b][sel]
        Dm = jnp.sum(jnp.abs(X[:, None, :] - Y[None, :, :]), axis=-1)
        cd = cd + Dm.min(axis=1).mean() + Dm.min(axis=0).mean()
    cd = cd / B
    if converging_to == "chamfer":
        return l1 + jnp.exp(-l1) * cd
    return cd + jnp.exp(-cd) * l1


if __name__ == "__main__":
    key = jax.random.PRNGKey(0)

    def _make_inputs(B, N):
        k1, k2, k3, k4 = jax.random.split(jax.random.fold_in(key, B), 4)
        pred = 0.1 * jax.random.normal(k1, (B, N, 3), jnp.float32)
        target = 0.1 * jax.random.normal(k2, (B, N, 3), jnp.float32)
        points = jax.random.normal(k3, (B, N, 3), jnp.float32)
        mask = (jax.random.uniform(k4, (B, N)) > 0.3).astype(jnp.float32)
        mask = mask.at[:, 0].set(1.0)   # guarantee >= 1 valid point per batch
        return pred, target, mask, points

    # Auto-picked tiling (exercises the chip-aware picker) on B=2 and B=4.
    for (B, N) in ((2, 128), (4, 128)):
        pred, target, mask, points = _make_inputs(B, N)
        for mode in ("chamfer", "L1"):
            out = masked_adaptive_l1_chamfer_loss(pred, target, mask, points,
                                                  converging_to=mode)
            out = jax.block_until_ready(out)
            ref = _ref_loss(pred, target, mask, points, converging_to=mode)
            assert jnp.allclose(out, ref, rtol=1e-4, atol=1e-5), (B, mode, out, ref)

    # Explicit tilings: multi-step grid (TB=1, G=4) and fat single step (TB=4, G=1)
    # both exercise the in-kernel fori_loop path regardless of detected chip.
    pred, target, mask, points = _make_inputs(4, 128)
    for tb in (1, 2, 4):
        out = masked_adaptive_l1_chamfer_loss(pred, target, mask, points,
                                              converging_to="chamfer",
                                              batch_tile=tb)
        out = jax.block_until_ready(out)
        ref = _ref_loss(pred, target, mask, points, converging_to="chamfer")
        assert jnp.allclose(out, ref, rtol=1e-4, atol=1e-5), (tb, out, ref)

    print("KERNEL_OK")
</pallas_src>

<mosaic_0001>
module attributes {stable_mosaic.version = 11 : i64} {
  func.func @_loss_kernel(%arg0: i32, %arg1: memref<2x3x128xf32, #tpu.memory_space<vmem>>, %arg2: memref<2x3x128xf32, #tpu.memory_space<vmem>>, %arg3: memref<2x4x128xf32, #tpu.memory_space<vmem>>, %arg4: memref<2x128x4xf32, #tpu.memory_space<vmem>>, %arg5: memref<1x1x128xf32, #tpu.memory_space<vmem>>) attributes {dimension_semantics = [#tpu.dimension_semantics<parallel>], iteration_bounds = array<i64: 1>, scalar_prefetch = 0 : i64, scratch_operands = 0 : i64, tpu.core_type = #tpu.core_type<tc>, window_params = [{transform_indices = @transform_0, window_bounds = array<i64: 2, 3, 128>}, {transform_indices = @transform_1, window_bounds = array<i64: 2, 3, 128>}, {transform_indices = @transform_2, window_bounds = array<i64: 2, 4, 128>}, {transform_indices = @transform_3, window_bounds = array<i64: 2, 128, 4>}, {transform_indices = @transform_4, window_bounds = array<i64: 1, 1, 128>}]} {
    %cst = arith.constant 0.000000e+00 : f32
    %cst_0 = arith.constant 0.000000e+00 : f32
    %cst_1 = arith.constant 0.000000e+00 : f32
    %c0_i32 = arith.constant 0 : i32
    %c2_i32 = arith.constant 2 : i32
    %0 = arith.addi %c0_i32, %c2_i32 : i32
    %c1_i32 = arith.constant 1 : i32
    %1:3 = scf.for %arg6 = %c0_i32 to %0 step %c1_i32 iter_args(%arg7 = %cst, %arg8 = %cst_0, %arg9 = %cst_1) -> (f32, f32, f32)  : i32 {
      %21 = arith.index_cast %arg6 : i32 to index
      %c0_11 = arith.constant 0 : index
      %c0_12 = arith.constant 0 : index
      %22 = vector.load %arg1[%21, %c0_11, %c0_12] : memref<2x3x128xf32, #tpu.memory_space<vmem>>, vector<1x3x128xf32>
      %23 = vector.shape_cast %22 : vector<1x3x128xf32> to vector<3x128xf32>
      %24 = arith.index_cast %arg6 : i32 to index
      %c0_13 = arith.constant 0 : index
      %c0_14 = arith.constant 0 : index
      %25 = vector.load %arg2[%24, %c0_13, %c0_14] : memref<2x3x128xf32, #tpu.memory_space<vmem>>, vector<1x3x128xf32>
      %26 = vector.shape_cast %25 : vector<1x3x128xf32> to vector<3x128xf32>
      %27 = arith.index_cast %arg6 : i32 to index
      %c0_15 = arith.constant 0 : index
      %c0_16 = arith.constant 0 : index
      %28 = vector.load %arg3[%27, %c0_15, %c0_16] : memref<2x4x128xf32, #tpu.memory_space<vmem>>, vector<1x4x128xf32>
      %29 = vector.shape_cast %28 : vector<1x4x128xf32> to vector<4x128xf32>
      %30 = arith.index_cast %arg6 : i32 to index
      %c0_17 = arith.constant 0 : index
      %c0_18 = arith.constant 0 : index
      %31 = vector.load %arg4[%30, %c0_17, %c0_18] : memref<2x128x4xf32, #tpu.memory_space<vmem>>, vector<1x128x4xf32>
      %32 = vector.shape_cast %31 : vector<1x128x4xf32> to vector<128x4xf32>
      %33 = vector.extract_strided_slice %29 {offsets = [3, 0], sizes = [1, 128], strides = [1, 1]} : vector<4x128xf32> to vector<1x128xf32>
      %34 = vector.extract_strided_slice %32 {offsets = [0, 3], sizes = [128, 1], strides = [1, 1]} : vector<128x4xf32> to vector<128x1xf32>
      %35 = arith.subf %23, %26 : vector<3x128xf32>
      %36 = math.absf %35 : vector<3x128xf32>
      %37 = vector.extract_strided_slice %36 {offsets = [0, 0], sizes = [1, 128], strides = [1, 1]} : vector<3x128xf32> to vector<1x128xf32>
      %38 = vector.extract_strided_slice %36 {offsets = [1, 0], sizes = [1, 128], strides = [1, 1]} : vector<3x128xf32> to vector<1x128xf32>
      %39 = arith.addf %37, %38 : vector<1x128xf32>
      %40 = vector.extract_strided_slice %36 {offsets = [2, 0], sizes = [1, 128], strides = [1, 1]} : vector<3x128xf32> to vector<1x128xf32>
      %41 = arith.addf %39, %40 : vector<1x128xf32>
      %cst_19 = arith.constant 0.333333343 : f32
      %42 = vector.broadcast %cst_19 : f32 to vector<1x128xf32>
      %43 = arith.mulf %41, %42 : vector<1x128xf32>
      %44 = arith.mulf %43, %33 : vector<1x128xf32>
      %45 = vector.shape_cast %44 : vector<1x128xf32> to vector<1x1x128xf32>
      %cst_20 = arith.constant dense<0.000000e+00> : vector<1xf32>
      %46 = vector.multi_reduction <add>, %45, %cst_20 [1, 2] : vector<1x1x128xf32> to vector<1xf32>
      %47 = vector.shape_cast %46 : vector<1xf32> to vector<1x1x1xf32>
      %48 = vector.extract %47[0, 0, 0] : f32 from vector<1x1x1xf32>
      %49 = arith.addf %arg7, %48 : f32
      %50 = vector.shape_cast %33 : vector<1x128xf32> to vector<1x1x128xf32>
      %cst_21 = arith.constant dense<0.000000e+00> : vector<1xf32>
      %51 = vector.multi_reduction <add>, %50, %cst_21 [1, 2] : vector<1x1x128xf32> to vector<1xf32>
      %52 = vector.shape_cast %51 : vector<1xf32> to vector<1x1x1xf32>
      %53 = vector.extract %52[0, 0, 0] : f32 from vector<1x1x1xf32>
      %54 = arith.addf %arg8, %53 : f32
      %55 = vector.extract_strided_slice %32 {offsets = [0, 0], sizes = [128, 1], strides = [1, 1]} : vector<128x4xf32> to vector<128x1xf32>
      %56 = vector.extract_strided_slice %29 {offsets = [0, 0], sizes = [1, 128], strides = [1, 1]} : vector<4x128xf32> to vector<1x128xf32>
      %57 = vector.broadcast %55 : vector<128x1xf32> to vector<128x128xf32>
      %58 = vector.broadcast %56 : vector<1x128xf32> to vector<128x128xf32>
      %59 = arith.subf %57, %58 : vector<128x128xf32>
      %60 = math.absf %59 : vector<128x128xf32>
      %61 = vector.extract_strided_slice %32 {offsets = [0, 1], sizes = [128, 1], strides = [1, 1]} : vector<128x4xf32> to vector<128x1xf32>
      %62 = vector.extract_strided_slice %29 {offsets = [1, 0], sizes = [1, 128], strides = [1, 1]} : vector<4x128xf32> to vector<1x128xf32>
      %63 = vector.broadcast %61 : vector<128x1xf32> to vector<128x128xf32>
      %64 = vector.broadcast %62 : vector<1x128xf32> to vector<128x128xf32>
      %65 = arith.subf %63, %64 : vector<128x128xf32>
      %66 = math.absf %65 : vector<128x128xf32>
      %67 = arith.addf %60, %66 : vector<128x128xf32>
      %68 = vector.extract_strided_slice %32 {offsets = [0, 2], sizes = [128, 1], strides = [1, 1]} : vector<128x4xf32> to vector<128x1xf32>
      %69 = vector.extract_strided_slice %29 {offsets = [2, 0], sizes = [1, 128], strides = [1, 1]} : vector<4x128xf32> to vector<1x128xf32>
      %70 = vector.broadcast %68 : vector<128x1xf32> to vector<128x128xf32>
      %71 = vector.broadcast %69 : vector<1x128xf32> to vector<128x128xf32>
      %72 = arith.subf %70, %71 : vector<128x128xf32>
      %73 = math.absf %72 : vector<128x128xf32>
      %74 = arith.addf %67, %73 : vector<128x128xf32>
      %cst_22 = arith.constant dense<0x7F800000> : vector<128xf32>
      %75 = vector.multi_reduction <minimumf>, %74, %cst_22 [1] : vector<128x128xf32> to vector<128xf32>
      %76 = vector.shape_cast %75 : vector<128xf32> to vector<128x1xf32>
      %cst_23 = arith.constant dense<0x7F800000> : vector<128xf32>
      %77 = vector.multi_reduction <minimumf>, %74, %cst_23 [0] : vector<128x128xf32> to vector<128xf32>
      %78 = vector.shape_cast %77 : vector<128xf32> to vector<1x128xf32>
      %79 = arith.mulf %76, %34 : vector<128x1xf32>
      %80 = vector.shape_cast %79 : vector<128x1xf32> to vector<1x128x1xf32>
      %cst_24 = arith.constant dense<0.000000e+00> : vector<1xf32>
      %81 = vector.multi_reduction <add>, %80, %cst_24 [1, 2] : vector<1x128x1xf32> to vector<1xf32>
      %82 = vector.shape_cast %81 : vector<1xf32> to vector<1x1x1xf32>
      %83 = vector.extract %82[0, 0, 0] : f32 from vector<1x1x1xf32>
      %84 = arith.mulf %78, %33 : vector<1x128xf32>
      %85 = vector.shape_cast %84 : vector<1x128xf32> to vector<1x1x128xf32>
      %cst_25 = arith.constant dense<0.000000e+00> : vector<1xf32>
      %86 = vector.multi_reduction <add>, %85, %cst_25 [1, 2] : vector<1x1x128xf32> to vector<1xf32>
      %87 = vector.shape_cast %86 : vector<1xf32> to vector<1x1x1xf32>
      %88 = vector.extract %87[0, 0, 0] : f32 from vector<1x1x1xf32>
      %89 = arith.addf %83, %88 : f32
      %90 = arith.divf %89, %53 : f32
      %91 = arith.addf %arg9, %90 : f32
      scf.yield %49, %54, %91 : f32, f32, f32
    }
    %c2_i32_2 = arith.constant 2 : i32
    %2 = tpu.iota {dimensions = array<i32: 2>} : vector<1x1x128xi32>
    %c0_i32_3 = arith.constant 0 : i32
    %3 = vector.broadcast %c0_i32_3 : i32 to vector<1x1x128xi32>
    %4 = arith.cmpi eq, %2, %3 : vector<1x1x128xi32>
    %cst_4 = arith.constant 0.000000e+00 : f32
    %5 = vector.broadcast %1#0 : f32 to vector<1x1x128xf32>
    %6 = vector.broadcast %cst_4 : f32 to vector<1x1x128xf32>
    %7 = arith.select %4, %5, %6 : vector<1x1x128xi1>, vector<1x1x128xf32>
    %c1_i32_5 = arith.constant 1 : i32
    %8 = vector.broadcast %c1_i32_5 : i32 to vector<1x1x128xi32>
    %9 = arith.cmpi eq, %2, %8 : vector<1x1x128xi32>
    %cst_6 = arith.constant 0.000000e+00 : f32
    %10 = vector.broadcast %1#1 : f32 to vector<1x1x128xf32>
    %11 = vector.broadcast %cst_6 : f32 to vector<1x1x128xf32>
    %12 = arith.select %9, %10, %11 : vector<1x1x128xi1>, vector<1x1x128xf32>
    %13 = arith.addf %7, %12 : vector<1x1x128xf32>
    %c2_i32_7 = arith.constant 2 : i32
    %14 = vector.broadcast %c2_i32_7 : i32 to vector<1x1x128xi32>
    %15 = arith.cmpi eq, %2, %14 : vector<1x1x128xi32>
    %cst_8 = arith.constant 0.000000e+00 : f32
    %16 = vector.broadcast %1#2 : f32 to vector<1x1x128xf32>
    %17 = vector.broadcast %cst_8 : f32 to vector<1x1x128xf32>
    %18 = arith.select %15, %16, %17 : vector<1x1x128xi1>, vector<1x1x128xf32>
    %19 = arith.addf %13, %18 : vector<1x1x128xf32>
    %c0 = arith.constant 0 : index
    %c0_9 = arith.constant 0 : index
    %c0_10 = arith.constant 0 : index
    %20 = vector.load %arg5[%c0, %c0_9, %c0_10] : memref<1x1x128xf32, #tpu.memory_space<vmem>>, vector<1x1x128xf32>
    tpu.vector_store %arg5[%c0, %c0_9, %c0_10], %19 {strides = array<i32>} : memref<1x1x128xf32, #tpu.memory_space<vmem>>, vector<1x1x128xf32>,
    return
  }
  func.func @transform_0(%arg0: i32) -> (i32, i32, i32) {
    %c0_i32 = arith.constant 0 : i32
    %c0_i32_0 = arith.constant 0 : i32
    %c0_i32_1 = arith.constant 0 : i32
    return %arg0, %c0_i32, %c0_i32_0 : i32, i32, i32
  }
  func.func @transform_1(%arg0: i32) -> (i32, i32, i32) {
    %c0_i32 = arith.constant 0 : i32
    %c0_i32_0 = arith.constant 0 : i32
    %c0_i32_1 = arith.constant 0 : i32
    return %arg0, %c0_i32, %c0_i32_0 : i32, i32, i32
  }
  func.func @transform_2(%arg0: i32) -> (i32, i32, i32) {
    %c0_i32 = arith.constant 0 : i32
    %c0_i32_0 = arith.constant 0 : i32
    %c0_i32_1 = arith.constant 0 : i32
    return %arg0, %c0_i32, %c0_i32_0 : i32, i32, i32
  }
  func.func @transform_3(%arg0: i32) -> (i32, i32, i32) {
    %c0_i32 = arith.constant 0 : i32
    %c0_i32_0 = arith.constant 0 : i32
    %c0_i32_1 = arith.constant 0 : i32
    return %arg0, %c0_i32, %c0_i32_0 : i32, i32, i32
  }
  func.func @transform_4(%arg0: i32) -> (i32, i32, i32) {
    %c0_i32 = arith.constant 0 : i32
    %c0_i32_0 = arith.constant 0 : i32
    %c0_i32_1 = arith.constant 0 : i32
    return %arg0, %c0_i32, %c0_i32_0 : i32, i32, i32
  }
}

</mosaic_0001>

<bundles_post_ra>
// kernel: tpu_custom_call.1
= control target key start
LH: loop header
LB: loop body
LE: loop exit
PB: predicated region body
PF: predicated region fallthrough
CT: control target
= control target key end

     0   :  { %9 = vsyncpa [#allocation3], 0  ;;  %s845_s15 = smov 0.0   ;;  %s847_s16 = smov 0.0   ;;  %s1196_s0 = inlined_call_operand.vmem [shape: f32[2,3,128], index: 0, kind: input, shape index: {}]   ;;  %s1197_s1 = inlined_call_operand.vmem [shape: f32[2,3,128], index: 1, kind: input, shape index: {}]   ;;  %s1198_s2 = inlined_call_operand.vmem [shape: f32[2,4,128], index: 2, kind: input, shape index: {}]   ;;  %s1199_s3 = inlined_call_operand.vmem [shape: f32[2,128,4], index: 3, kind: input, shape index: {}]   ;;  %s1200_s4 = inlined_call_operand.hbm [shape: f32[1,1,128], index: 4, kind: output, shape index: {}]  }
   0x1   :  { %s849_s17 = smov 0.0   ;;  %s851_s18 = smov 0  }
   0x2 LB: > { %v815_v0 = vmov 1   ;;  %s682_s19 = sshll.u32 %s813_s18, 7  ;;  %v816_v8 = vmov 2   ;;  %v817_v11 = vmov 0   ;;  %v169_v26 = vlaneseq  ;;  %s1009_s23 = sshll.u32 %s813_s18, 2  ;;  %s813_s18 = sphi %s851_s18, %s23_s18   ;;  %s809_s17 = sphi %s849_s17, %s1205_s17   ;;  %s805_s16 = sphi %s847_s16, %s1204_s16   ;;  %s801_s15 = sphi %s845_s15, %s1203_s15  }
   0x3   : > { %733 = vset.pattern.permute.xlu0 %v815_v0  ;;  %730 = vset.pattern.permute.xlu1 %v815_v0  ;;  %s871_s22 = scalar_lea.vmem %s1199_s3, %s682_s19  ;;  %s32_s26 = scalar_lea.vmem %s1198_s2, %s1009_s23  ;;  %vm66_vm0 = vcmask 1040384   ;;  %vm570_vm1 = vcmask 7168  }
   0x4   : > { %v874_v1 = vld [vmem:[%s871_s22 + $0x18] sm:$0xff]  ;;  %v878_v2 = vld [vmem:[%s871_s22] sm:$0xff]  ;;  %v885_v4 = vld [vmem:[%s871_s22 + $0x8] sm:$0xff]  ;;  %v170_v29 = vshrl.u32 %v169_v26, 7  ;;  %s28_s29 = scalar_lea.vmem %s1196_s0, %s1009_s23  ;;  %s30_s6 = scalar_lea.vmem %s1197_s1, %s1009_s23 }
   0x5   : > { %218 = vperm.xlu0 %733, %v874_v1   ;;  %206 = vperm.xlu1 %730, %v878_v2   ;;  %v882_v3 = vld [vmem:[%s871_s22 + $0x20] sm:$0xff]  ;;  %v893_v6 = vld [vmem:[%s871_s22 + $0x10] sm:$0xff]  ;;  %v898_v7 = vld [vmem:[%s871_s22 + $0x48] sm:$0xff]  ;;  %s818_s7 = smov 125   ;;  %s23_s18 = sadd.s32 1, %s813_s18  }
   0x6   : > { %v890_v5 = vld [vmem:[%s871_s22 + $0x40] sm:$0xff]  ;;  %v903_v9 = vld [vmem:[%s871_s22 + $0x68] sm:$0xff]  ;;  %v908_v10 = vld [vmem:[%s871_s22 + $0x70] sm:$0xff]  ;;  %v171_v32 = vsub.s32 0, %v170_v29  ;;  %v271_v33 = vsub.s32 1, %v170_v29  ;;  %v387_v34 = vsub.s32 2, %v170_v29 }
   0x7   : > { %v924_v12 = vld [vmem:[%s871_s22 + $0x28] sm:$0xff]  ;;  %v929_v13 = vld [vmem:[%s871_s22 + $0x30] sm:$0xff]  ;;  %v940_v15 = vld [vmem:[%s871_s22 + $0x58] sm:$0xff]  ;;  %p20_p0 = scmp.ge.s32.totalorder %s23_s18, 2  }
   0x8   : > { %v934_v14 = vld [vmem:[%s871_s22 + $0x50] sm:$0xff]  ;;  %v946_v16 = vld [vmem:[%s871_s22 + $0x78] sm:$0xff]  ;;  %v978_v18 = vld [vmem:[%s871_s22 + $0x60] sm:$0xff]  ;;  %s819_s20 = smov (%p20_p0), [#allocation2]  }
   0x9   : > { %222 = vperm.xlu0 %733, %v882_v3   ;;  %210 = vperm.xlu1 %730, %v885_v4   ;;  %v949_v17 = vld [vmem:[%s871_s22 + $0x38] sm:$0xff]  ;;  %v1018_v35 = vld [vmem:[%s32_s26] sm:$0xf]  ;;  %s651_s21 = sshll.u32 (%p20_p0), %s819_s20, 4  ;;  %s652_s21 = int_to_ptr.vmem [resolvable:$true] %s651_s21 }
   0xa   : > { %v1021_v38 = vrot.slane %v1018_v35, %v171_v32  ;;  %v1024_v39 = vrot.slane %v1018_v35, %v271_v33  ;;  %v1027_v40 = vrot.slane %v1018_v35, %v387_v34  ;;  %s761_s18 = scalar_lea.vmem (%p20_p0), %s652_s21, 16  ;;  %s765_s0 = scalar_lea.vmem (%p20_p0), %s652_s21, 32 }
   0xb   :  { %p762_p1 = scmp.ne.s32.totalorder (%p20_p0), %s652_s21, %s761_s18  ;;  %p766_p2 = scmp.lt.s32.totalorder (%p20_p0), %s652_s21, %s652_s21 }
   0xc   :  { %p767_p3 = scmp.lt.s32.totalorder (%p20_p0), %s765_s0, %s761_s18 }
   0xd   : > { %238 = vperm.xlu0 %733, %v890_v5   ;;  %214 = vperm.xlu1 %730, %v893_v6  }
   0xe   :  { %p768_p4 = por (%p20_p0), %p767_p3, %p766_p2 }
  0x10   :  { %p769_p5 = pnand (%p20_p0), %p768_p4, %p762_p1 }
  0x11   : > { %242 = vperm.xlu0 %733, %v898_v7   ;;  %731 = vset.pattern.permute.xlu1 %v816_v8 }
  0x12   : > { %326 = vperm.xlu1 %731, %v885_v4  }
  0x15   : > { %258 = vperm.xlu0 %733, %v903_v9  }
  0x16   : > { %732 = vset.pattern.permute.xlu1 %v817_v11 }
  0x17   : > { %106 = vperm.xlu1 %732, %v874_v1  }
  0x19   : > { %262 = vperm.xlu0 %733, %v908_v10  }
  0x1b   : > { %734 = vset.pattern.permute.xlu1 %v816_v8 }
  0x1c   : > { %330 = vperm.xlu1 %734, %v893_v6  }
  0x1d   : > { %754 = vset.pattern.permute.xlu0 %v817_v11 }
  0x1e   : > { %91 = vperm.xlu0 %754, %v878_v2  }
  0x20   : > { %735 = vset.pattern.permute.xlu1 %v817_v11 }
  0x21   : > { %111 = vperm.xlu1 %735, %v882_v3  }
  0x22   : > { %96 = vperm.xlu0 %754, %v885_v4  }
  0x25   : > { %736 = vset.pattern.permute.xlu1 %v816_v8 }
  0x26   : > { %101 = vperm.xlu0 %754, %v893_v6   ;;  %334 = vperm.xlu1 %736, %v874_v1  }
  0x2a   : > { %116 = vperm.xlu0 %754, %v924_v12   ;;  %737 = vset.pattern.permute.xlu1 %v815_v0 }
  0x2b   : > { %226 = vperm.xlu1 %737, %v924_v12  }
  0x2e   : > { %121 = vperm.xlu0 %754, %v929_v13  }
  0x2f   : > { %738 = vset.pattern.permute.xlu1 %v816_v8 }
  0x30   : > { %338 = vperm.xlu1 %738, %v882_v3  }
  0x32   : > { %141 = vperm.xlu0 %754, %v934_v14  }
  0x34   : > { %739 = vset.pattern.permute.xlu1 %v815_v0 }
  0x35   : > { %230 = vperm.xlu1 %739, %v929_v13  }
  0x36   : > { %146 = vperm.xlu0 %754, %v940_v15  }
  0x39   : > { %740 = vset.pattern.permute.xlu1 %v817_v11 }
  0x3a   : > { %166 = vperm.xlu0 %754, %v946_v16   ;;  %126 = vperm.xlu1 %740, %v949_v17  }
  0x3e   : > { %756 = vset.pattern.permute.xlu0 %v816_v8  ;;  %741 = vset.pattern.permute.xlu1 %v815_v0 }
  0x3f   : > { %322 = vperm.xlu0 %756, %v878_v2   ;;  %234 = vperm.xlu1 %741, %v949_v17  }
  0x43   : > { %342 = vperm.xlu0 %756, %v924_v12   ;;  %742 = vset.pattern.permute.xlu1 %v817_v11 }
  0x44   : > { %131 = vperm.xlu1 %742, %v890_v5  }
  0x47   : > { %346 = vperm.xlu0 %756, %v929_v13  }
  0x48   : > { %743 = vset.pattern.permute.xlu1 %v816_v8 }
  0x49   : > { %350 = vperm.xlu1 %743, %v949_v17  }
  0x4b   : > { %362 = vperm.xlu0 %756, %v934_v14  }
  0x4d   : > { %744 = vset.pattern.permute.xlu1 %v817_v11 }
  0x4e   : > { %136 = vperm.xlu1 %744, %v898_v7  }
  0x4f   : > { %366 = vperm.xlu0 %756, %v940_v15  }
  0x52   : > { %745 = vset.pattern.permute.xlu1 %v816_v8 }
  0x53   : > { %382 = vperm.xlu0 %756, %v946_v16   ;;  %354 = vperm.xlu1 %745, %v890_v5  }
  0x57   : > { %746 = vset.pattern.permute.xlu1 %v815_v0 }
  0x58   : > { %246 = vperm.xlu1 %746, %v934_v14  }
  0x5c   : > { %747 = vset.pattern.permute.xlu1 %v816_v8 }
  0x5d   : > { %358 = vperm.xlu1 %747, %v898_v7  }
  0x61   : > { %748 = vset.pattern.permute.xlu1 %v815_v0 }
  0x62   : > { %250 = vperm.xlu1 %748, %v940_v15  }
  0x66   : > { %749 = vset.pattern.permute.xlu1 %v817_v11 }
  0x67   : > { %151 = vperm.xlu1 %749, %v978_v18  }
  0x6b   : > { %750 = vset.pattern.permute.xlu1 %v815_v0 }
  0x6c   : > { %254 = vperm.xlu1 %750, %v978_v18  }
  0x70   : > { %751 = vset.pattern.permute.xlu1 %v817_v11 }
  0x71   : > { %156 = vperm.xlu1 %751, %v903_v9  }
  0x75   : > { %752 = vset.pattern.permute.xlu1 %v816_v8 }
  0x76   : > { %370 = vperm.xlu1 %752, %v978_v18  }
  0x7a   : > { %753 = vset.pattern.permute.xlu1 %v817_v11 }
  0x7b   : > { %161 = vperm.xlu1 %753, %v908_v10  }
  0x7f   : > { %755 = vset.pattern.permute.xlu1 %v816_v8 }
  0x80   : > { %v219_v19 = vpop.permute.xlu0 %218  ;;  %374 = vperm.xlu1 %755, %v903_v9   ;;  %v992_v20 = vpop.permute.xlu1 %206 }
  0x81   : > { %v276_v47 = vsub.f32 %v219_v19, %v1024_v39 }
  0x83   : > { %v292_v56 = vand.u32 2147483647, %v276_v47 }
  0x84   : > { %v994_v21 = vpop.permute.xlu0 %222  ;;  %757 = vset.pattern.permute.xlu1 %v815_v0  ;;  %v211_v22 = vpop.permute.xlu1 %210 }
  0x85   : > { %266 = vperm.xlu1 %757, %v946_v16   ;;  %v274_v41 = vsub.f32 %v211_v22, %v1024_v39  ;;  %v277_v32 = vsub.f32 %v994_v21, %v1024_v39 }
  0x87   : > { %v290_v48 = vand.u32 2147483647, %v274_v41  ;;  %v293_v47 = vand.u32 2147483647, %v277_v32 }
  0x88   : > { %v998_v23 = vpop.permute.xlu0 %238  ;;  %v1000_v24 = vpop.permute.xlu1 %214 }
  0x89   : > { %758 = vset.pattern.permute.xlu1 %v816_v8 }
  0x8a   : > { %378 = vperm.xlu1 %758, %v908_v10  }
  0x8c   : > { %v1004_v25 = vpop.permute.xlu0 %242 }
  0x8d   : > { %v327_v27 = vpop.permute.xlu1 %326 }
  0x8e   : > { %v390_v44 = vsub.f32 %v327_v27, %v1027_v40 }
  0x90   : > { %v1006_v28 = vpop.permute.xlu0 %258  ;;  %v406_v51 = vand.u32 2147483647, %v390_v44 }
  0x92   : > { %v107_v30 = vpop.permute.xlu1 %106 }
  0x93   : > { %v176_v45 = vsub.f32 %v107_v30, %v1021_v38  ;;  %v273_v30 = vsub.f32 %v992_v20, %v1024_v39 }
  0x94   : > { %v1016_v31 = vpop.permute.xlu0 %262 }
  0x95   : > { %v192_v52 = vand.u32 2147483647, %v176_v45 }
  0x97   : > { %v331_v36 = vpop.permute.xlu1 %330  ;;  %v308_v60 = vadd.f32 %v292_v56, %v192_v52 }
  0x98   : > { %v391_v20 = vsub.f32 %v331_v36, %v1027_v40 }
  0x99   : > { %v92_v37 = vpop.permute.xlu0 %91 }
  0x9a   : > { %v173_v22 = vsub.f32 %v92_v37, %v1021_v38 }
  0x9c   : > { %v112_v42 = vpop.permute.xlu1 %111  ;;  %v189_v44 = vand.u32 2147483647, %v173_v22 }
  0x9d   : > { %v97_v43 = vpop.permute.xlu0 %96  ;;  %v177_v27 = vsub.f32 %v112_v42, %v1021_v38 }
  0x9e   : > { %v174_v46 = vsub.f32 %v97_v43, %v1021_v38  ;;  %v275_v43 = vsub.f32 %v1000_v24, %v1024_v39 }
  0x9f   : > { %v193_v37 = vand.u32 2147483647, %v177_v27 }
  0xa0   : > { %v190_v49 = vand.u32 2147483647, %v174_v46  ;;  %v289_v46 = vand.u32 2147483647, %v273_v30  ;;  %v291_v52 = vand.u32 2147483647, %v275_v43 }
  0xa1   : > { %v102_v50 = vpop.permute.xlu0 %101  ;;  %v335_v54 = vpop.permute.xlu1 %334 }
  0xa2   : > { %v306_v53 = vadd.f32 %v290_v48, %v190_v49  ;;  %v392_v55 = vsub.f32 %v335_v54, %v1027_v40  ;;  %v175_v33 = vsub.f32 %v102_v50, %v1021_v38  ;;  %v309_v54 = vadd.f32 %v293_v47, %v193_v37 }
  0xa4   : > { %v1035_v57 = vadd.f32 %v406_v51, %v306_v53  ;;  %v408_v58 = vand.u32 2147483647, %v392_v55  ;;  %v191_v48 = vand.u32 2147483647, %v175_v33  ;;  %v305_v53 = vadd.f32 %v289_v46, %v189_v44 }
  0xa5   : > { %v117_v59 = vpop.permute.xlu0 %116 }
  0xa6   : > { %439 = vmin.xlane.f32.xlu0 %v1035_v57  ;;  %v227_v61 = vpop.permute.xlu1 %226  ;;  %v1038_v62 = vadd.f32 %v408_v58, %v308_v60  ;;  %v178_v42 = vsub.f32 %v117_v59, %v1021_v38  ;;  %v407_v59 = vand.u32 2147483647, %v391_v20  ;;  %v307_v60 = vadd.f32 %v291_v52, %v191_v48 }
  0xa7   : > { %v278_v45 = vsub.f32 %v227_v61, %v1024_v39 }
  0xa8   : > { %v194_v24 = vand.u32 2147483647, %v178_v42  ;;  %v423_v20 = vadd.f32 %v407_v59, %v307_v60 }
  0xa9   : > { %v122_v63 = vpop.permute.xlu0 %121  ;;  %v294_v55 = vand.u32 2147483647, %v278_v45 }
  0xaa   : > { %443 = vmin.xlane.f32.xlu0 %v1038_v62  ;;  %v179_v22 = vsub.f32 %v122_v63, %v1021_v38 }
  0xab   : > { %v339_v0 = vpop.permute.xlu1 %338 }
  0xac   : > { %v393_v41 = vsub.f32 %v339_v0, %v1027_v40  ;;  %v195_v46 = vand.u32 2147483647, %v179_v22 }
  0xad   : > { %v1041_v8 = vpop.permute.xlu0 %141 }
  0xae   : > { %v409_v49 = vand.u32 2147483647, %v393_v41  ;;  %v310_v41 = vadd.f32 %v294_v55, %v194_v24 }
  0xb0   : > { %v231_v19 = vpop.permute.xlu1 %230  ;;  %v425_v32 = vadd.f32 %v409_v49, %v309_v54 }
  0xb1   : > { %v1043_v11 = vpop.permute.xlu0 %146  ;;  %v279_v56 = vsub.f32 %v231_v19, %v1024_v39 }
  0xb3   : > { %v295_v43 = vand.u32 2147483647, %v279_v56 }
  0xb5   : > { %v1047_v29 = vpop.permute.xlu0 %166  ;;  %v127_v34 = vpop.permute.xlu1 %126  ;;  %v311_v48 = vadd.f32 %v295_v43, %v195_v46  ;;  %v282_v43 = vsub.f32 %v1004_v25, %v1024_v39 }
  0xb6   : > { %v180_v61 = vsub.f32 %v127_v34, %v1021_v38 }
  0xb8   : > { %v196_v37 = vand.u32 2147483647, %v180_v61 }
  0xba   : > { %v323_v21 = vpop.permute.xlu0 %322  ;;  %v235_v51 = vpop.permute.xlu1 %234 }
  0xbb   : > { %v389_v50 = vsub.f32 %v323_v21, %v1027_v40  ;;  %v280_v36 = vsub.f32 %v235_v51, %v1024_v39 }
  0xbd   : > { %v405_v58 = vand.u32 2147483647, %v389_v50  ;;  %v296_v42 = vand.u32 2147483647, %v280_v36 }
  0xbe   : > { %v343_v0 = vpop.permute.xlu0 %342 }
  0xbf   : > { %v394_v27 = vsub.f32 %v343_v0, %v1027_v40  ;;  %v421_v30 = vadd.f32 %v405_v58, %v305_v53  ;;  %v132_v33 = vpop.permute.xlu1 %131  ;;  %v312_v50 = vadd.f32 %v296_v42, %v196_v37  ;;  %v281_v58 = vsub.f32 %v998_v23, %v1024_v39 }
  0xc0   : > { %v181_v24 = vsub.f32 %v132_v33, %v1021_v38 }
  0xc1   : > { %v410_v44 = vand.u32 2147483647, %v394_v27  ;;  %437 = vmin.xlane.f32.xlu1 %v421_v30  ;;  %v469_v19 = vmin.f32 %v421_v30, %v425_v32  ;;  %v297_v61 = vand.u32 2147483647, %v281_v58  ;;  %v183_v30 = vsub.f32 %v1041_v8, %v1021_v38 }
  0xc2   : > { %v347_v45 = vpop.permute.xlu0 %346 }
  0xc3   : > { %v395_v34 = vsub.f32 %v347_v45, %v1027_v40  ;;  %v426_v47 = vadd.f32 %v410_v44, %v310_v41  ;;  %v199_v37 = vand.u32 2147483647, %v183_v30 }
  0xc4   : > { %v351_v21 = vpop.permute.xlu1 %350 }
  0xc5   : > { %v411_v63 = vand.u32 2147483647, %v395_v34  ;;  %447 = vmin.xlane.f32.xlu0 %v426_v47  ;;  %v470_v49 = vmin.f32 %v1035_v57, %v426_v47  ;;  %441 = vmin.xlane.f32.xlu1 %v423_v20  ;;  %v396_v51 = vsub.f32 %v351_v21, %v1027_v40  ;;  %v197_v57 = vand.u32 2147483647, %v181_v24 }
  0xc6   : > { %v363_v22 = vpop.permute.xlu0 %362  ;;  %v298_v47 = vand.u32 2147483647, %v282_v43 }
  0xc7   : > { %v427_v52 = vadd.f32 %v411_v63, %v311_v48  ;;  %v412_v53 = vand.u32 2147483647, %v396_v51  ;;  %v313_v0 = vadd.f32 %v297_v61, %v197_v57  ;;  %v399_v23 = vsub.f32 %v363_v22, %v1027_v40 }
  0xc8   : > { %v184_v51 = vsub.f32 %v1043_v11, %v1021_v38 }
  0xc9   : > { %445 = vmin.xlane.f32.xlu1 %v425_v32  ;;  %v471_v54 = vmin.f32 %v423_v20, %v427_v52  ;;  %v137_v55 = vpop.permute.xlu1 %136  ;;  %v428_v56 = vadd.f32 %v412_v53, %v312_v50  ;;  %v415_v46 = vand.u32 2147483647, %v399_v23 }
  0xca   : > { %v182_v32 = vsub.f32 %v137_v55, %v1021_v38  ;;  %v367_v21 = vpop.permute.xlu0 %366 }
  0xcb   : > { %v472_v59 = vmin.f32 %v1038_v62, %v428_v56  ;;  %451 = vmin.xlane.f32.xlu0 %v428_v56  ;;  %v400_v53 = vsub.f32 %v367_v21, %v1027_v40  ;;  %v200_v56 = vand.u32 2147483647, %v184_v51 }
  0xcc   : > { %v198_v45 = vand.u32 2147483647, %v182_v32 }
  0xcd   : > { %449 = vmin.xlane.f32.xlu1 %v427_v52  ;;  %v416_v57 = vand.u32 2147483647, %v400_v53 }
  0xce   : > { %v355_v60 = vpop.permute.xlu1 %354  ;;  %v314_v63 = vadd.f32 %v298_v47, %v198_v45  ;;  %v383_v47 = vpop.permute.xlu0 %382 }
  0xcf   : > { %v397_v36 = vsub.f32 %v355_v60, %v1027_v40 }
  0xd1   : > { %v413_v27 = vand.u32 2147483647, %v397_v36 }
  0xd3   : > { %v247_v33 = vpop.permute.xlu1 %246  ;;  %v429_v41 = vadd.f32 %v413_v27, %v313_v0 }
  0xd4   : > { %v283_v62 = vsub.f32 %v247_v33, %v1024_v39 }
  0xd5   : > { %453 = vmin.xlane.f32.xlu1 %v429_v41  ;;  %v1081_v44 = vmin.f32 %v469_v19, %v429_v41 }
  0xd6   : > { %v299_v42 = vand.u32 2147483647, %v283_v62 }
  0xd8   : > { %v315_v34 = vadd.f32 %v299_v42, %v199_v37  ;;  %v359_v8 = vpop.permute.xlu1 %358 }
  0xd9   : > { %v398_v20 = vsub.f32 %v359_v8, %v1027_v40 }
  0xda   : > { %v431_v48 = vadd.f32 %v415_v46, %v315_v34 }
  0xdb   : > { %v414_v50 = vand.u32 2147483647, %v398_v20 }
  0xdc   : > { %v1086_v25 = vmin.f32 %v471_v54, %v431_v48  ;;  %457 = vmin.xlane.f32.xlu1 %v431_v48 }
  0xdd   : > { %v251_v19 = vpop.permute.xlu1 %250  ;;  %v430_v52 = vadd.f32 %v414_v50, %v314_v63  ;;  %v188_v63 = vsub.f32 %v1047_v29, %v1021_v38 }
  0xde   : > { %v284_v24 = vsub.f32 %v251_v19, %v1024_v39 }
  0xdf   : > { %455 = vmin.xlane.f32.xlu0 %v430_v52  ;;  %v474_v55 = vmin.f32 %v470_v49, %v430_v52  ;;  %v204_v53 = vand.u32 2147483647, %v188_v63 }
  0xe0   : > { %v300_v58 = vand.u32 2147483647, %v284_v24 }
  0xe2   : > { %v316_v60 = vadd.f32 %v300_v58, %v200_v56  ;;  %v152_v61 = vpop.permute.xlu1 %151 }
  0xe3   : > { %v185_v54 = vsub.f32 %v152_v61, %v1021_v38 }
  0xe4   : > { %v432_v36 = vadd.f32 %v416_v57, %v316_v60 }
  0xe5   : > { %v201_v30 = vand.u32 2147483647, %v185_v54 }
  0xe6   : > { %v476_v0 = vmin.f32 %v472_v59, %v432_v36  ;;  %459 = vmin.xlane.f32.xlu0 %v432_v36  ;;  %v286_v59 = vsub.f32 %v1006_v28, %v1024_v39  ;;  %v404_v28 = vsub.f32 %v383_v47, %v1027_v40 }
  0xe7   : > { %v255_v11 = vpop.permute.xlu1 %254 }
  0xe8   : > { %v285_v22 = vsub.f32 %v255_v11, %v1024_v39  ;;  %v302_v34 = vand.u32 2147483647, %v286_v59  ;;  %v420_v57 = vand.u32 2147483647, %v404_v28 }
  0xea   : > { %v301_v32 = vand.u32 2147483647, %v285_v22 }
  0xec   : > { %v157_v27 = vpop.permute.xlu1 %156  ;;  %v317_v41 = vadd.f32 %v301_v32, %v201_v30  ;;  %v29_v30 = vld [vmem:[%s28_s29] sm:$0x7] }
  0xed   : > { %v186_v62 = vsub.f32 %v157_v27, %v1021_v38  ;;  %v31_v32 = vld [vmem:[%s30_s6] sm:$0x7] }
  0xef   : > { %v202_v45 = vand.u32 2147483647, %v186_v62 }
  0xf1   : > { %v371_v33 = vpop.permute.xlu1 %370  ;;  %v318_v20 = vadd.f32 %v302_v34, %v202_v45 }
  0xf2   : > { %v401_v49 = vsub.f32 %v371_v33, %v1027_v40 }
  0xf4   : > { %v417_v23 = vand.u32 2147483647, %v401_v49 }
  0xf6   : > { %v162_v43 = vpop.permute.xlu1 %161  ;;  %v433_v37 = vadd.f32 %v417_v23, %v317_v41 }
  0xf7   : > { %v187_v21 = vsub.f32 %v162_v43, %v1021_v38 }
  0xf8   : > { %461 = vmin.xlane.f32.xlu1 %v433_v37  ;;  %v477_v42 = vmin.f32 %v1081_v44, %v433_v37  ;;  %v287_v44 = vsub.f32 %v1016_v31, %v1024_v39  ;;  %v63_v37 = vrot.slane %v1018_v35, 3 }
  0xf9   : > { %v203_v56 = vand.u32 2147483647, %v187_v21 }
  0xfa   : > { %v303_v60 = vand.u32 2147483647, %v287_v44  ;;  %v78_v21 = vsel %vm66_vm0, %v63_v37, 0.0 }
  0xfb   : > { %v375_v46 = vpop.permute.xlu1 %374 }
  0xfc   : > { %v402_v8 = vsub.f32 %v375_v46, %v1027_v40  ;;  %v319_v11 = vadd.f32 %v303_v60, %v203_v56 }
  0xfe   : > { %v418_v48 = vand.u32 2147483647, %v402_v8 }
 0x100   : > { %v267_v50 = vpop.permute.xlu1 %266  ;;  %v434_v51 = vadd.f32 %v418_v48, %v318_v20 }
 0x101   : > { %v288_v19 = vsub.f32 %v267_v50, %v1024_v39 }
 0x102   : > { %463 = vmin.xlane.f32.xlu0 %v434_v51  ;;  %v478_v52 = vmin.f32 %v474_v55, %v434_v51 }
 0x103   : > { %v304_v24 = vand.u32 2147483647, %v288_v19 }
 0x104   : > { %v481_v58 = vmin.f32 %v477_v42, %v478_v52 }
 0x105   : > { %v320_v29 = vadd.f32 %v304_v24, %v204_v53  ;;  %v379_v38 = vpop.permute.xlu1 %378 }
 0x106   : > { %v403_v61 = vsub.f32 %v379_v38, %v1027_v40 }
 0x107   : > { %v436_v36 = vadd.f32 %v420_v57, %v320_v29 }
 0x108   : > { %v419_v54 = vand.u32 2147483647, %v403_v61 }
 0x109   : > { %v480_v22 = vmin.f32 %v476_v0, %v436_v36  ;;  %467 = vmin.xlane.f32.xlu0 %v436_v36 }
 0x10a   : > { %v435_v31 = vadd.f32 %v419_v54, %v319_v11 }
 0x10c   : > { %v479_v39 = vmin.f32 %v1086_v25, %v435_v31  ;;  %465 = vmin.xlane.f32.xlu1 %v435_v31  ;;  %v52_v25 = vsub.f32 %v29_v30, %v31_v32 }
 0x10e   : > { %v482_v55 = vmin.f32 %v479_v39, %v480_v22  ;;  %v53_v33 = vand.u32 2147483647, %v52_v25 }
 0x110   : > { %v1107_v27 = vmin.f32 %v481_v58, %v482_v55  ;;  %v55_v41 = vrot.slane %v53_v33, 1  ;;  %v58_v23 = vrot.slane %v53_v33, 2 }
 0x112   : > { %v57_v49 = vadd.f32 %v55_v41, %v53_v33 }
 0x114   : > { %v60_v62 = vadd.f32 %v58_v23, %v57_v49 }
 0x116   : > { %v61_v43 = vmul.f32 0.33333334, %v60_v62 }
 0x118   : > { %v65_v42 = vmul.f32 %v63_v37, %v61_v43 }
 0x12f   : > { %v440_v40 = vpop.xlane.xlu0 %439 }
 0x130   : > { %v491_v0 = vmul.f32 %v440_v40, %v885_v4  ;;  %v67_v4 = vsel %vm66_vm0, %v65_v42, 0.0 }
 0x132   : > { %524 = vrot.lane.b32.xlu0 %v491_v0, %s818_s7 }
 0x133   : > { %v444_v51 = vpop.xlane.xlu0 %443 }
 0x14a   : > { %v438_v59 = vpop.xlane.xlu1 %437 }
 0x14b   : > { %v490_v45 = vmul.f32 %v438_v59, %v878_v2 }
 0x14d   : > { %522 = vrot.lane.b32.xlu1 %v490_v45, %s818_s7 }
 0x14e   : > { %v442_v46 = vpop.xlane.xlu1 %441  ;;  %v448_v19 = vpop.xlane.xlu0 %447 }
 0x151   : > { %68 = vadd.xlane.f32.xlu0 %v67_v4 }
 0x152   : > { %v446_v34 = vpop.xlane.xlu1 %445 }
 0x153   : > { %v494_v8 = vmul.f32 %v446_v34, %v882_v3  ;;  %v492_v3 = vmul.f32 %v442_v46, %v893_v6 }
 0x154   : > { %v452_v44 = vpop.xlane.xlu0 %451 }
 0x155   : > { %v497_v6 = vmul.f32 %v452_v44, %v949_v17  ;;  %v484_v17 = vrot.slane %v1107_v27, 4 }
 0x156   : > { %v450_v47 = vpop.xlane.xlu1 %449 }
 0x157   : > { %v496_v20 = vmul.f32 %v450_v47, %v929_v13 }
 0x15e   : > { %v454_v48 = vpop.xlane.xlu1 %453 }
 0x15f   : > { %v498_v2 = vmul.f32 %v454_v48, %v890_v5  ;;  %v493_v5 = vmul.f32 %v444_v51, %v874_v1 }
 0x165   : > { %v458_v63 = vpop.xlane.xlu1 %457 }
 0x166   : > { %v500_v50 = vmul.f32 %v458_v63, %v934_v14  ;;  %v495_v14 = vmul.f32 %v448_v19, %v924_v12 }
 0x167   : > { %530 = vrot.lane.b32.xlu0 %v494_v8, %s818_s7 }
 0x168   : > { %v456_v52 = vpop.xlane.xlu0 %455 }
 0x169   : > { %v499_v53 = vmul.f32 %v456_v52, %v898_v7 }
 0x16b   : > { %534 = vrot.lane.b32.xlu0 %v496_v20, %s818_s7 }
 0x16f   : > { %538 = vrot.lane.b32.xlu0 %v498_v2, %s818_s7 }
 0x171   : > { %79 = vadd.xlane.f32.xlu1 %v78_v21 }
 0x173   : > { %542 = vrot.lane.b32.xlu0 %v500_v50, %s818_s7 }
 0x181   : > { %v462_v28 = vpop.xlane.xlu1 %461 }
 0x182   : > { %526 = vrot.lane.b32.xlu1 %v492_v3, %s818_s7  ;;  %v502_v13 = vmul.f32 %v462_v28, %v978_v18  ;;  %v460_v18 = vpop.xlane.xlu0 %459 }
 0x183   : > { %v501_v1 = vmul.f32 %v460_v18, %v940_v15  ;;  %v485_v15 = vmin.f32 %v1107_v27, %v484_v17 }
 0x184   : > { %546 = vrot.lane.b32.xlu0 %v502_v13, %s818_s7 }
 0x185   : > { %v486_v29 = vrot.slane %v485_v15, 2 }
 0x186   : > { %528 = vrot.lane.b32.xlu1 %v493_v5, %s818_s7 }
 0x187   : > { %v487_v38 = vmin.f32 %v485_v15, %v486_v29 }
 0x189   : > { %v488_v60 = vrot.slane %v487_v38, 1 }
 0x18a   : > { %532 = vrot.lane.b32.xlu1 %v495_v14, %s818_s7 }
 0x18b   : > { %v464_v24 = vpop.xlane.xlu0 %463  ;;  %v489_v61 = vmin.f32 %v487_v38, %v488_v60 }
 0x18c   : > { %v503_v58 = vmul.f32 %v464_v24, %v903_v9 }
 0x18e   : > { %536 = vrot.lane.b32.xlu1 %v497_v6, %s818_s7 }
 0x192   : > { %540 = vrot.lane.b32.xlu1 %v499_v53, %s818_s7  ;;  %v468_v57 = vpop.xlane.xlu0 %467 }
 0x193   : > { %v505_v7 = vmul.f32 %v468_v57, %v946_v16 }
 0x195   : > { %v466_v56 = vpop.xlane.xlu1 %465 }
 0x196   : > { %544 = vrot.lane.b32.xlu1 %v501_v1, %s818_s7  ;;  %v504_v12 = vmul.f32 %v466_v56, %v908_v10  ;;  %v611_v10 = vmul.f32 %v489_v61, %v1018_v35 }
 0x198   : > { %550 = vrot.lane.b32.xlu0 %v504_v12, %s818_s7  ;;  %v613_v9 = vrot.slane %v611_v10, 3 }
 0x19a   : > { %548 = vrot.lane.b32.xlu1 %v503_v58, %s818_s7  ;;  %v615_v36 = vsel %vm66_vm0, %v613_v9, 0.0 }
 0x19e   : > { %552 = vrot.lane.b32.xlu1 %v505_v7, %s818_s7 }
 0x1a4   : > { %v525_v11 = vpop.permute.xlu0 %524 }
 0x1a5   : > { %v572_v41 = vsel %vm570_vm1, %v525_v11, 0.0 }
 0x1bf   : > { %v523_v27 = vpop.permute.xlu1 %522 }
 0x1c0   : > { %v571_v35 = vsel %vm570_vm1, %v523_v27, 0.0 }
 0x1c1   : > { %v573_v62 = vadd.f32 %v572_v41, %v571_v35 }
 0x1c2   : > { %616 = vadd.xlane.f32.xlu1 %v615_v36 }
 0x1da   : > { %v69_v54 = vpop.xlane.xlu0 %68 }
 0x1db   : > { %v70_v22 = vrot.slane %v69_v54, 4 }
 0x1dd   : > { %v71_v16 = vadd.f32 %v70_v22, %v69_v54 }
 0x1de   : > { %v531_v0 = vpop.permute.xlu0 %530 }
 0x1df   : > { %v72_v31 = vrot.slane %v71_v16, 2  ;;  %v578_v34 = vsel %vm570_vm1, %v531_v0, 0.0 }
 0x1e1   : > { %v73_v39 = vadd.f32 %v72_v31, %v71_v16 }
 0x1e2   : > { %v535_v37 = vpop.permute.xlu0 %534 }
 0x1e3   : > { %v74_v55 = vrot.slane %v73_v39, 1  ;;  %v582_v21 = vsel %vm570_vm1, %v535_v37, 0.0 }
 0x1e5   : > { %v75_v40 = vadd.f32 %v74_v55, %v73_v39 }
 0x1e6   : > { %v539_v2 = vpop.permute.xlu0 %538 }
 0x1e7   : > { %683 = vpush %v75_v40  ;;  %v586_v13 = vsel %vm570_vm1, %v539_v2, 0.0 }
 0x1ea   : > { %v543_v5 = vpop.permute.xlu0 %542 }
 0x1eb   : > { %v590_v52 = vsel %vm570_vm1, %v543_v5, 0.0 }
 0x1f6   : > { %v547_v53 = vpop.permute.xlu0 %546 }
 0x1f7   : > { %v594_v12 = vsel %vm570_vm1, %v547_v53, 0.0 }
 0x1fa   : > { %v80_v30 = vpop.xlane.xlu1 %79 }
 0x1fb   : > { %v81_v32 = vrot.slane %v80_v30, 4 }
 0x1fd   : > { %v82_v25 = vadd.f32 %v81_v32, %v80_v30 }
 0x1fe   : > { %v527_v33 = vpop.permute.xlu1 %526 }
 0x1ff   : > { %v83_v49 = vrot.slane %v82_v25, 2  ;;  %v574_v23 = vsel %vm570_vm1, %v527_v33, 0.0  ;;  %v632_v33 = vand.u32 (%p20_p0), 127, %v169_v26 }
 0x200   : > { %v575_v59 = vadd.f32 %v574_v23, %v573_v62 }
 0x201   : > { %v84_v43 = vadd.f32 %v83_v49, %v82_v25  ;;  %vm633_vm2 = vcmp.eq.s32.totalorder (%p20_p0), %v632_v33, 0  ;;  %vm636_vm3 = vcmp.eq.s32.totalorder (%p20_p0), %v632_v33, 1  ;;  %vm640_vm4 = vcmp.eq.s32.totalorder (%p20_p0), %v632_v33, 2 }
 0x202   : > { %v529_v42 = vpop.permute.xlu1 %528 }
 0x203   : > { %v576_v45 = vsel %vm570_vm1, %v529_v42, 0.0  ;;  %v85_v4 = vrot.slane %v84_v43, 1 }
 0x204   : > { %v577_v46 = vadd.f32 %v576_v45, %v575_v59 }
 0x205   : > { %v86_v8 = vadd.f32 %v85_v4, %v84_v43 }
 0x206   : > { %v533_v47 = vpop.permute.xlu1 %532  ;;  %v579_v20 = vadd.f32 %v578_v34, %v577_v46 }
 0x207   : > { %v580_v48 = vsel %vm570_vm1, %v533_v47, 0.0  ;;  %685 = vpush %v86_v8 }
 0x208   : > { %v581_v63 = vadd.f32 %v580_v48, %v579_v20 }
 0x20a   : > { %v537_v50 = vpop.permute.xlu1 %536  ;;  %v583_v3 = vadd.f32 %v582_v21, %v581_v63  ;;  %v551_v58 = vpop.permute.xlu0 %550 }
 0x20b   : > { %v584_v51 = vsel %vm570_vm1, %v537_v50, 0.0  ;;  %v598_v29 = vsel %vm570_vm1, %v551_v58, 0.0 }
 0x20c   : > { %v585_v28 = vadd.f32 %v584_v51, %v583_v3 }
 0x20e   : > { %v541_v19 = vpop.permute.xlu1 %540  ;;  %v587_v14 = vadd.f32 %v586_v13, %v585_v28 }
 0x20f   : > { %v588_v44 = vsel %vm570_vm1, %v541_v19, 0.0 }
 0x210   : > { %v589_v6 = vadd.f32 %v588_v44, %v587_v14 }
 0x212   : > { %v545_v18 = vpop.permute.xlu1 %544  ;;  %v591_v1 = vadd.f32 %v590_v52, %v589_v6 }
 0x213   : > { %v592_v24 = vsel %vm570_vm1, %v545_v18, 0.0 }
 0x214   : > { %v593_v56 = vadd.f32 %v592_v24, %v591_v1 }
 0x216   : > { %v549_v57 = vpop.permute.xlu1 %548  ;;  %v595_v7 = vadd.f32 %v594_v12, %v593_v56 }
 0x217   : > { %v596_v17 = vsel %vm570_vm1, %v549_v57, 0.0 }
 0x218   : > { %v597_v15 = vadd.f32 %v596_v17, %v595_v7  ;;  %s684_s8 = spop %683 }
 0x219   : > { %s1172_s17 = sadd.f32 %s809_s17, %s684_s8  }
 0x21a   : > { %v553_v38 = vpop.permute.xlu1 %552  ;;  %v599_v60 = vadd.f32 %v598_v29, %v597_v15 }
 0x21b   : > { %s1201_s9 = smov %s1172_s17  ;;  %v600_v61 = vsel %vm570_vm1, %v553_v38, 0.0 }
 0x21c   : > { %v601_v10 = vadd.f32 %v600_v61, %v599_v60  ;;  %v634_v41 = vstv (%p20_p0), %s1201_s9 }
 0x21d   :  { %v635_v62 = vsel (%p20_p0), %vm633_vm2, %v634_v41, 0.0 }
 0x21e   : > { %602 = vadd.xlane.f32.xlu0 %v601_v10 }
 0x238   : > { %s686_s10 = spop %685 }
 0x239   : > { %s1176_s16 = sadd.f32 %s805_s16, %s686_s10   ;;  %v626_v54 = vstv %s686_s10 }
 0x23a   : > { %759 = vrcp.f32 %v626_v54 }
 0x23b   : > { %s1202_s11 = smov %s1176_s16 }
 0x23c   :  { %v637_v49 = vstv (%p20_p0), %s1202_s11 }
 0x23d   :  { %v638_v43 = vsel (%p20_p0), %vm636_vm3, %v637_v49, 0.0 }
 0x23e   :  { %v639_v59 = vadd.f32 (%p20_p0), %v638_v43, %v635_v62 }
 0x247   : > { %v760_v25 = vpop.eup %759 }
 0x24b   : > { %v617_v9 = vpop.xlane.xlu1 %616 }
 0x24c   : > { %v618_v36 = vrot.slane %v617_v9, 4 }
 0x24e   : > { %v619_v11 = vadd.f32 %v618_v36, %v617_v9 }
 0x250   : > { %v620_v22 = vrot.slane %v619_v11, 2 }
 0x252   : > { %v621_v55 = vadd.f32 %v620_v22, %v619_v11 }
 0x254   : > { %v622_v30 = vrot.slane %v621_v55, 1 }
 0x256   : > { %v623_v35 = vadd.f32 %v622_v30, %v621_v55 }
 0x2a7   : > { %v603_v16 = vpop.xlane.xlu0 %602 }
 0x2a8   : > { %v604_v31 = vrot.slane %v603_v16, 4 }
 0x2aa   : > { %v605_v39 = vadd.f32 %v604_v31, %v603_v16 }
 0x2ac   : > { %v606_v40 = vrot.slane %v605_v39, 2 }
 0x2ae   : > { %v607_v27 = vadd.f32 %v606_v40, %v605_v39 }
 0x2b0   : > { %v608_v32 = vrot.slane %v607_v27, 1 }
 0x2b2   : > { %v609_v0 = vadd.f32 %v608_v32, %v607_v27 }
 0x2b4   : > { %687 = vpush %v609_v0 }
 0x2b5   : > { %689 = vpush %v623_v35 }
 0x2b6   : > { %691 = vpush %v760_v25 }
 0x2e5   : > { %s688_s12 = spop %687 }
 0x2e6   : > { %s690_s13 = spop %689 }
 0x2e7   : > { %s625_s14 = sadd.f32 %s690_s13, %s688_s12  ;;  %s692_s16 = spop %691 }
 0x2e9   : > { %s629_s17 = smul.f32 %s692_s16, %s625_s14  ;;  %s1204_s16 = smov %s1202_s11 }
 0x2ea   :  { %22 = sbr.rel (!%p20_p0) target bundleno = 2 (0x2), region = 47 }
 0x2eb   : > { %s630_s19 = sadd.f32 %s801_s15, %s629_s17   ;;  %s1205_s17 = smov %s1201_s9 }
 0x2ed   : > { %s1203_s15 = smov %s630_s19  ;;  %v641_v23 = vstv (%p20_p0), %s630_s19 }
 0x2ee   :  { %v642_v37 = vsel (%p20_p0), %vm640_vm4, %v641_v23, 0.0 }
 0x2ef   :  { %v643_v42 = vadd.f32 %v642_v37, %v639_v59 }
 0x2f1   :  { %644 = vst [vmem:[#allocation2] sm:$0x1] %v643_v42 }
 0x2f2   :  { %772 = shalt.err (!%p769_p5)
}
 0x2f3   :  { %654 = dma.vmem_to_hbm [thread:$0]  %s652_s21, 16, %s1200_s4, [#allocation3]  }
 0x2f4   :  { %797 = dma.done.wait [#allocation3], 16  }
 0x2f5   :  { %798 = vsyncadd [#allocation3], 4294967280 }
 0x2f6   :  { %658 = vsyncpa [#allocation3], 1 }

</bundles_post_ra>
